<compile_context>
chip_gen: v7x
topology: tpu7x:2x2x1
jax: 0.10.0
libtpu: 0.0.40
codegen_flags: <defaults>
</compile_context>

<pallas_src>
import jax
import jax.numpy as jnp
from jax.experimental import pallas as pl
from jax.experimental.pallas import tpu as pltpu


def _depatch_kernel(x_ref, o_ref):
    # x_ref: (W, th, C) = x4[n, :, h0:h0+th, :]  where x4 = x.reshape(N, W, H, C)
    # o_ref: (C, th, W) = out[n, :, h0:h0+th, :]
    # out[n, c, h, w] = x4[n, w, h, c]  ->  pure axis reversal (XLU transpose),
    # no MXU work, no strided sublane gathers, no intermediate slab.
    o_ref[...] = jnp.transpose(x_ref[...], (2, 1, 0))


def _sublane_granularity(dtype):
    # second-to-last block-dim granularity per dtype packing (f32:8, 16-bit:16, 8-bit:32)
    return {4: 8, 2: 16, 1: 32}.get(jnp.dtype(dtype).itemsize, 8)


def _pick_h_tile(N, C, H, W, dtype, target_block_bytes=6 << 20):
    """H-rows per grid step: divisor of H, multiple of the sublane granularity,
    sized to a few MiB; keep >=2 h-tiles when batch alone can't feed 2 v7x TCs."""
    sub = _sublane_granularity(dtype)
    cands = [t for t in range(sub, H + 1, sub) if H % t == 0]
    if not cands:
        return H  # tiny H: full-extent block is always legal
    per_row = W * C * jnp.dtype(dtype).itemsize
    fitting = [t for t in cands if t * per_row <= target_block_bytes]
    th = max(fitting) if fitting else cands[0]
    if N < 2 and th == H and len(cands) >= 2:
        th = max(t for t in cands if t < H)  # give the 2nd TensorCore some h-tiles
    return int(th)


def depatch_embed(x, ori_shape, patch_size=1):
    N, num_patches, dim = x.shape
    _, C, H, W = ori_shape
    if patch_size != 1:
        # TODO(synk): general patch_size > 1 (p*p sub-block scatter) not implemented; module default is p=1.
        raise NotImplementedError("only patch_size=1 is supported")
    assert dim == C and num_patches == H * W and H == W, \
        "DePatchEmbed (p=1) assumes dim == C, num_patches == H*W, and square H == W"

    itemsize = jnp.dtype(x.dtype).itemsize
    # Free row-major metadata reshape: row k = w*H + h  ->  (w, h).
    x4 = x.reshape(N, W, H, C)

    th = _pick_h_tile(N, C, H, W, x.dtype)
    block_bytes = W * th * C * itemsize
    # in + out blocks, double-buffered, plus transpose scratch headroom;
    # capped safely below v7x's 64 MiB physical VMEM.
    vmem_limit = int(min(48 << 20, max(32 << 20, 6 * block_bytes + (4 << 20))))

    grid = (N, H // th)

    out = pl.pallas_call(
        _depatch_kernel,
        out_shape=jax.ShapeDtypeStruct((N, C, H, W), x.dtype),  # native dtype preserved
        grid_spec=pltpu.PrefetchScalarGridSpec(
            num_scalar_prefetch=0,
            grid=grid,
            in_specs=[pl.BlockSpec((None, W, th, C), lambda n, hi: (n, 0, hi, 0))],
            out_specs=pl.BlockSpec((None, C, th, W), lambda n, hi: (n, 0, hi, 0)),
        ),
        compiler_params=pltpu.CompilerParams(
            dimension_semantics=("parallel", "parallel"),
            vmem_limit_bytes=vmem_limit),
        cost_estimate=pl.CostEstimate(
            flops=0, transcendentals=0,
            bytes_accessed=2 * N * H * W * C * itemsize),
    )(x4)
    return out


if __name__ == "__main__":
    # Small shapes consistent with IllTr_Net: embed_dim = mid_channels = 16, 16x16 spatial.
    N, C, H, W = 2, 16, 16, 16
    key = jax.random.PRNGKey(0)
    x = jax.random.normal(key, (N, H * W, C), dtype=jnp.float32)  # (N, num_patches, dim)
    ori_shape = (N, C, H, W)

    out = jax.block_until_ready(depatch_embed(x, ori_shape, patch_size=1))

    # Pure-JAX reference of the PyTorch loop semantics (p=1):
    #   out[n, c, h, w] = x[n, w*H + h, c]
    ref = jnp.transpose(x.reshape(N, W, H, C), (0, 3, 2, 1))
    assert out.shape == (N, C, H, W) and out.dtype == x.dtype
    assert jnp.array_equal(out, ref), "kernel output mismatch vs reference"
    print("KERNEL_OK")
</pallas_src>

<mosaic_0001>
module attributes {stable_mosaic.version = 11 : i64} {
  func.func @_depatch_kernel(%arg0: i32, %arg1: i32, %arg2: memref<1x16x16x16xf32, #tpu.memory_space<vmem>>, %arg3: memref<1x16x16x16xf32, #tpu.memory_space<vmem>>) attributes {dimension_semantics = [#tpu.dimension_semantics<parallel>, #tpu.dimension_semantics<parallel>], iteration_bounds = array<i64: 2, 1>, scalar_prefetch = 0 : i64, scratch_operands = 0 : i64, tpu.core_type = #tpu.core_type<tc>, window_params = [{transform_indices = @transform_0, window_bounds = array<i64: 1, 16, 16, 16>}, {transform_indices = @transform_1, window_bounds = array<i64: 1, 16, 16, 16>}]} {
    %c0 = arith.constant 0 : index
    %c0_0 = arith.constant 0 : index
    %c0_1 = arith.constant 0 : index
    %c0_2 = arith.constant 0 : index
    %0 = vector.load %arg2[%c0, %c0_0, %c0_1, %c0_2] : memref<1x16x16x16xf32, #tpu.memory_space<vmem>>, vector<1x16x16x16xf32>
    %1 = vector.shape_cast %0 : vector<1x16x16x16xf32> to vector<16x16x16xf32>
    %2 = tpu.transpose %1, [2, 1, 0] : vector<16x16x16xf32> -> vector<16x16x16xf32>
    %c0_3 = arith.constant 0 : index
    %c0_4 = arith.constant 0 : index
    %c0_5 = arith.constant 0 : index
    %c0_6 = arith.constant 0 : index
    %3 = vector.load %arg3[%c0_3, %c0_4, %c0_5, %c0_6] : memref<1x16x16x16xf32, #tpu.memory_space<vmem>>, vector<1x16x16x16xf32>
    %4 = vector.shape_cast %3 : vector<1x16x16x16xf32> to vector<16x16x16xf32>
    %5 = vector.shape_cast %2 : vector<16x16x16xf32> to vector<1x16x16x16xf32>
    tpu.vector_store %arg3[%c0_3, %c0_4, %c0_5, %c0_6], %5 {strides = array<i32>} : memref<1x16x16x16xf32, #tpu.memory_space<vmem>>, vector<1x16x16x16xf32>,
    return
  }
  func.func @transform_0(%arg0: i32, %arg1: i32) -> (i32, i32, i32, i32) {
    %c0_i32 = arith.constant 0 : i32
    %c0_i32_0 = arith.constant 0 : i32
    %c0_i32_1 = arith.constant 0 : i32
    return %arg0, %c0_i32, %arg1, %c0_i32_0 : i32, i32, i32, i32
  }
  func.func @transform_1(%arg0: i32, %arg1: i32) -> (i32, i32, i32, i32) {
    %c0_i32 = arith.constant 0 : i32
    %c0_i32_0 = arith.constant 0 : i32
    %c0_i32_1 = arith.constant 0 : i32
    return %arg0, %c0_i32, %arg1, %c0_i32_0 : i32, i32, i32, i32
  }
}

</mosaic_0001>

<bundles_post_ra>
// kernel: tpu_custom_call.1
= control target key start
LH: loop header
LB: loop body
LE: loop exit
PB: predicated region body
PF: predicated region fallthrough
CT: control target
= control target key end

     0   :  { %6 = vsyncpa [#allocation3], 0  ;;  %s2607_s0 = inlined_call_operand.hbm [shape: f32[2,16,16,16], index: 0, kind: input, shape index: {}]   ;;  %s2608_s1 = inlined_call_operand.hbm [shape: f32[2,16,16,16], index: 1, kind: output, shape index: {}]  }
   0x1   :  { %8 = vsyncpa [#allocation3 + $0x1], 0 }
   0x2   :  { %9 = vsyncpa [#allocation4], 0 }
   0x3   :  { %11 = vsyncpa [#allocation4 + $0x1], 0  ;;  %s2109_s6 = smov 0   ;;  %s2111_s7 = smov 0  }
   0x4   :  { %s2113_s8 = smov 0   ;;  %s2115_s9 = smov 0  }
   0x5   :  { %s2117_s10 = smov 0   ;;  %s2119_s11 = smov 0  }
   0x6 LB: > { %s1891_s12 = sadd.s32 4294967295, %s2089_s11   ;;  %s1892_s13 = sadd.s32 4294967294, %s2089_s11   ;;  %s2089_s11 = sphi %s2119_s11, %s17_s11   ;;  %s2085_s10 = sphi %s2117_s10, %s2623_s10   ;;  %s2081_s9 = sphi %s2115_s9, %s2622_s9   ;;  %s2077_s8 = sphi %s2113_s8, %s2621_s8   ;;  %s2073_s7 = sphi %s2111_s7, %s2620_s7   ;;  %s2069_s6 = sphi %s2109_s6, %s2619_s6  }
   0x7   : > { %s29_s14 = sadd.s32 1, %s2085_s10  ;;  %s38_s15 = sadd.s32 1, %s2077_s8 }
   0x8   : > { %p31_p0 = scmp.ge.s32.totalorder %s29_s14, 2  ;;  %p45_p1 = scmp.ne.s32.totalorder %s2077_s8, %s2073_s7 }
   0x9   : > { %p46_p2 = scmp.eq.s32.totalorder %s2089_s11, 0  ;;  %p51_p3 = scmp.ne.s32.totalorder %s2073_s7, %s2069_s6 }
   0xa   : > { %s2625_s14 = smov (%p31_p0, %s29_s14), 0  ;;  %p52_p5 = scmp.eq.s32.totalorder %s1891_s12, 0 }
   0xb   : > { %p2150_p4 = por %p46_p2, %p45_p1  ;;  %s33_s17 = ssub.s32 %s2085_s10, %s2625_s14 }
   0xc   : > { %p77_p6 = scmp.eq.s32.totalorder %s1891_s12, 1  ;;  %p36_p7 = scmp.eq.s32.totalorder %s33_s17, 0 }
   0xd   : > { %p2156_p8 = por %p52_p5, %p51_p3  ;;  %p83_p10 = scmp.eq.s32.totalorder %s1892_s13, 1 }
   0xe   : > { %p2160_p9 = por %p77_p6, %p45_p1  ;;  %p1920_p13 = scmp.lt.s32.totalorder %s2089_s11, 2 }
   0xf   : > { %s2165_s20 = scalar_select %p36_p7, %s2077_s8, %s38_s15  }
  0x10   : > { %s2612_s19 = scalar_select %p2160_p9, 1, 0 }
  0x11   : > { %p2167_p11 = por %p83_p10, %p51_p3  ;;  %s103_s22 = sand.u32 1, %s2077_s8  }
  0x12   : > { %s1895_s23 = sshll.u32 %s103_s22, 8  ;;  %s1906_s24 = sshll.u32 %s2085_s10, 12 }
  0x13   : > { %s2613_s21 = scalar_select %p2167_p11, 1, 0 }
  0x14   : > { %s2178_s27 = scalar_lea.hbm %s2607_s0, %s1906_s24  ;;  %s107_s28 = scalar_lea.vmem [#allocation2], %s1895_s23 }
  0x15   : > { %s116_s29 = sshll.u32 %s107_s28, 4  ;;  %p2184_p0 = pnand %p1920_p13, %p2150_p4  ;;  %s2180_s29 = int_to_ptr.vmem [resolvable:$true] %s116_s29 }
  0x16   : > { %s2189_s2 = scalar_lea.sflag [#allocation3], %s103_s22  ;;  %s1977_s3 = scalar_lea.hbm %s2178_s27, 4096 }
  0x17   : > { %p1978_p2 = scmp.ne.s32.totalorder %s2178_s27, %s1977_s3  ;;  %p1979_p3 = pneg %p2184_p0 }
  0x18   : > { %s1982_s12 = scalar_lea.hbm %s2607_s0, 8192  ;;  %p1983_p4 = scmp.lt.u32.totalorder %s2178_s27, %s2607_s0 }
  0x19   : > { %p1980_p5 = pnand %p1979_p3, %p1978_p2  ;;  %p1984_p7 = scmp.lt.u32.totalorder %s1982_s12, %s1977_s3 }
  0x1a   : > { %p1986_p13 = scmp.lt.u32.totalorder %s1977_s3, %s2178_s27 }
  0x1b   : > { %p1981_p6 = pneg %p1980_p5  ;;  %p1985_p10 = por %p1984_p7, %p1983_p4 }
  0x1d   : > { %p1987_p12 = por %p1986_p13, %p1985_p10 }
  0x1f   : > { %p1988_p1 = pnand %p1987_p12, %p1981_p6 }
  0x21   : > { %1991 = shalt.err (!%p1988_p1)
}
  0x22   : > { %s1992_s16 = scalar_lea.vmem %s2180_s29, 4096  ;;  %s2091_s17 = smov [#allocation2]  }
  0x23   : > { %p1993_p2 = scmp.ne.s32.totalorder %s2180_s29, %s1992_s16  ;;  %s1997_s22 = sshll.u32 %s2091_s17, 4  ;;  %s1998_s22 = int_to_ptr.vmem [resolvable:$false] %s1997_s22 }
  0x24   : > { %s1999_s23 = scalar_lea.vmem %s1998_s22, 8192  ;;  %p2000_p9 = scmp.lt.s32.totalorder %s2180_s29, %s1998_s22 }
  0x25   : > { %p1995_p5 = pnand %p1993_p2, %p1979_p3  ;;  %p2001_p4 = scmp.lt.s32.totalorder %s1999_s23, %s1992_s16 }
  0x27   : > { %p1996_p11 = pneg %p1995_p5  ;;  %p2002_p7 = por %p2001_p4, %p2000_p9 }
  0x29   : > { %p2003_p10 = pnand %p2002_p7, %p1996_p11 }
  0x2b   : > { %2006 = shalt.err (!%p2003_p10)
}
  0x2c   : > { %s2092_s24 = smov 128   ;;  %s2093_s25 = smov 8  }
  0x2d   : > { %1915 = dma.hbm_to_vmem [thread:$0]  (!%p2184_p0), %s2178_s27, 4096, %s2180_s29, %s2189_s2, %s2092_s24, %s2092_s24, %s2093_s25  }
  0x2e   : > { %p124_p12 = scmp.lt.s32.totalorder %s2089_s11, 3  ;;  %p2615_p1 = scmp.ge.s32.totalorder %s2089_s11, 1 }
  0x30   : > { %p125_p3 = pnand %p2615_p1, %p124_p12 }
  0x31   : > { %s2221_s26 = sand.u32 (!%p125_p3), 1, %s2073_s7  }
  0x32   : > { %128 = sbr.rel (%p125_p3) target bundleno = 454 (0x1c6), region = 24  ;;  %s1899_s28 = sshll.u32 (!%p125_p3), %s2221_s26, 8 }
  0x33   : > { %s131_s3 = scalar_lea.sflag (!%p125_p3), [#allocation3], %s2221_s26  ;;  %s2227_s4 = scalar_lea.vmem (!%p125_p3), [#allocation2], %s1899_s28 }
  0x39   : > { %2060 = dma.done.wait (%p2156_p8), %s131_s3, 4096  }
  0x3a   : > { %2062 = vsyncadd (%p2156_p8), %s131_s3, 4294963200  ;;  %v157_v0 = vld [vmem:[%s2227_s4 + $0x10] sm:$0xff]  ;;  %v155_v1 = vld [vmem:[%s2227_s4] sm:$0xff]  ;;  %v2094_v32 = vmov 1983009808   ;;  %v704_v34 = vlaneseq  ;;  %vm1755_vm0 = vcmask 130048  }
  0x3b   : > { %219 = vxpose.xlu1.b32.start [1/2] (short) (narrow) %v157_v0, 16  ;;  %187 = vxpose.xlu0.b32.start [1/2] (short) (narrow) %v155_v1, 16  ;;  %v158_v2 = vld [vmem:[%s2227_s4 + $0x18] sm:$0xff]  ;;  %v156_v3 = vld [vmem:[%s2227_s4 + $0x8] sm:$0xff]  ;;  %v161_v4 = vld [vmem:[%s2227_s4 + $0x30] sm:$0xff]  ;;  %v702_v33 = vunpack.c.l.s4 %v2094_v32  ;;  %s2485_s18 = scalar_lea.vmem [#allocation5], %s1899_s28 }
  0x3c   : > { %v159_v5 = vld [vmem:[%s2227_s4 + $0x20] sm:$0xff]  ;;  %v162_v6 = vld [vmem:[%s2227_s4 + $0x38] sm:$0xff]  ;;  %v160_v7 = vld [vmem:[%s2227_s4 + $0x28] sm:$0xff]  ;;  %v705_v38 = vshrl.u32 %v704_v34, 7  ;;  %v2095_v44 = vmov 1934713408  }
  0x3d   : > { %v165_v8 = vld [vmem:[%s2227_s4 + $0x50] sm:$0xff]  ;;  %v163_v9 = vld [vmem:[%s2227_s4 + $0x40] sm:$0xff]  ;;  %v166_v10 = vld [vmem:[%s2227_s4 + $0x58] sm:$0xff]  ;;  %v703_v37 = vunpack.c.0.s8 %v702_v33  ;;  %v766_v45 = vunpack.c.l.s4 %v2095_v44  ;;  %s1907_s27 = sshll.u32 %s2081_s9, 12  ;;  %s1804_s29 = sshll.u32 %s2485_s18, 4  ;;  %s2554_s29 = int_to_ptr.vmem [resolvable:$true] %s1804_s29 }
  0x3e   : > { %v164_v11 = vld [vmem:[%s2227_s4 + $0x48] sm:$0xff]  ;;  %v169_v12 = vld [vmem:[%s2227_s4 + $0x70] sm:$0xff]  ;;  %v167_v13 = vld [vmem:[%s2227_s4 + $0x60] sm:$0xff]  ;;  %s2552_s5 = scalar_lea.hbm %s2608_s1, %s1907_s27  ;;  %s1789_s9 = scalar_lea.sflag [#allocation4], %s2221_s26 }
  0x3f   : > { %220 = vxpose.xlu1.b32.end [2/2] (short) (narrow) %v158_v2, 16  ;;  %188 = vxpose.xlu0.b32.end [2/2] (short) (narrow) %v156_v3, 16  ;;  %v170_v14 = vld [vmem:[%s2227_s4 + $0x78] sm:$0xff]  ;;  %v168_v15 = vld [vmem:[%s2227_s4 + $0x68] sm:$0xff]  ;;  %v173_v16 = vld [vmem:[%s2227_s4 + $0x90] sm:$0xff]  ;;  %v2265_v41 = vsub.s32 %v703_v37, %v705_v38  ;;  %v767_v52 = vunpack.c.0.s8 %v766_v45  ;;  %s2007_s12 = scalar_lea.vmem %s2554_s29, 4096 }
  0x40   : > { %v171_v17 = vld [vmem:[%s2227_s4 + $0x80] sm:$0xff]  ;;  %v174_v18 = vld [vmem:[%s2227_s4 + $0x98] sm:$0xff]  ;;  %v172_v19 = vld [vmem:[%s2227_s4 + $0x88] sm:$0xff]  ;;  %p2008_p8 = scmp.ne.s32.totalorder %s2554_s29, %s2007_s12  ;;  %p2616_p9 = scmp.ne.s32.totalorder %s2612_s19, 0 }
  0x41   : > { %v177_v20 = vld [vmem:[%s2227_s4 + $0xb0] sm:$0xff]  ;;  %v175_v21 = vld [vmem:[%s2227_s4 + $0xa0] sm:$0xff]  ;;  %v178_v22 = vld [vmem:[%s2227_s4 + $0xb8] sm:$0xff]  ;;  %v2285_v1 = vsub.s32 %v767_v52, %v705_v38  ;;  %s2096_s13 = smov [#allocation5]  }
  0x42   : > { %v176_v23 = vld [vmem:[%s2227_s4 + $0xa8] sm:$0xff]  ;;  %v181_v24 = vld [vmem:[%s2227_s4 + $0xd0] sm:$0xff]  ;;  %v179_v25 = vld [vmem:[%s2227_s4 + $0xc0] sm:$0xff]  ;;  %p2009_p11 = pnand %p2008_p8, %p2616_p9  ;;  %s2011_s15 = sshll.u32 %s2096_s13, 4  ;;  %s2012_s15 = int_to_ptr.vmem [resolvable:$false] %s2011_s15 }
  0x43   : > { %283 = vxpose.xlu1.b32.start [1/2] (short) (narrow) %v161_v4, 16  ;;  %251 = vxpose.xlu0.b32.start [1/2] (short) (narrow) %v159_v5, 16  ;;  %v182_v26 = vld [vmem:[%s2227_s4 + $0xd8] sm:$0xff]  ;;  %v180_v27 = vld [vmem:[%s2227_s4 + $0xc8] sm:$0xff]  ;;  %v185_v28 = vld [vmem:[%s2227_s4 + $0xf0] sm:$0xff]  ;;  %s2013_s16 = scalar_lea.vmem %s2012_s15, 8192  ;;  %p2014_p6 = scmp.lt.s32.totalorder %s2554_s29, %s2012_s15 }
  0x44   : > { %v183_v29 = vld [vmem:[%s2227_s4 + $0xe0] sm:$0xff]  ;;  %v186_v30 = vld [vmem:[%s2227_s4 + $0xf8] sm:$0xff]  ;;  %v184_v31 = vld [vmem:[%s2227_s4 + $0xe8] sm:$0xff]  ;;  %p2010_p0 = pneg %p2009_p11  ;;  %p2015_p13 = scmp.lt.s32.totalorder %s2013_s16, %s2007_s12 }
  0x46   : > { %p2016_p2 = por %p2015_p13, %p2014_p6 }
  0x47   : > { %284 = vxpose.xlu1.b32.end [2/2] (short) (narrow) %v162_v6, 16  ;;  %252 = vxpose.xlu0.b32.end [2/2] (short) (narrow) %v160_v7, 16 }
  0x48   : > { %p2017_p5 = pnand %p2016_p2, %p2010_p0 }
  0x4b   : > { %347 = vxpose.xlu1.b32.start [1/2] (short) (narrow) %v165_v8, 16  ;;  %315 = vxpose.xlu0.b32.start [1/2] (short) (narrow) %v163_v9, 16 }
  0x4f   : > { %348 = vxpose.xlu1.b32.end [2/2] (short) (narrow) %v166_v10, 16  ;;  %316 = vxpose.xlu0.b32.end [2/2] (short) (narrow) %v164_v11, 16 }
  0x53   : > { %411 = vxpose.xlu1.b32.start [1/2] (short) (narrow) %v169_v12, 16  ;;  %379 = vxpose.xlu0.b32.start [1/2] (short) (narrow) %v167_v13, 16 }
  0x57   : > { %412 = vxpose.xlu1.b32.end [2/2] (short) (narrow) %v170_v14, 16  ;;  %380 = vxpose.xlu0.b32.end [2/2] (short) (narrow) %v168_v15, 16 }
  0x5b   : > { %475 = vxpose.xlu1.b32.start [1/2] (short) (narrow) %v173_v16, 16  ;;  %443 = vxpose.xlu0.b32.start [1/2] (short) (narrow) %v171_v17, 16 }
  0x5f   : > { %476 = vxpose.xlu1.b32.end [2/2] (short) (narrow) %v174_v18, 16  ;;  %444 = vxpose.xlu0.b32.end [2/2] (short) (narrow) %v172_v19, 16 }
  0x63   : > { %539 = vxpose.xlu1.b32.start [1/2] (short) (narrow) %v177_v20, 16  ;;  %507 = vxpose.xlu0.b32.start [1/2] (short) (narrow) %v175_v21, 16 }
  0x67   : > { %540 = vxpose.xlu1.b32.end [2/2] (short) (narrow) %v178_v22, 16  ;;  %508 = vxpose.xlu0.b32.end [2/2] (short) (narrow) %v176_v23, 16 }
  0x6b   : > { %603 = vxpose.xlu1.b32.start [1/2] (short) (narrow) %v181_v24, 16  ;;  %571 = vxpose.xlu0.b32.start [1/2] (short) (narrow) %v179_v25, 16 }
  0x6f   : > { %604 = vxpose.xlu1.b32.end [2/2] (short) (narrow) %v182_v26, 16  ;;  %572 = vxpose.xlu0.b32.end [2/2] (short) (narrow) %v180_v27, 16 }
  0x73   : > { %667 = vxpose.xlu1.b32.start [1/2] (short) (narrow) %v185_v28, 16  ;;  %635 = vxpose.xlu0.b32.start [1/2] (short) (narrow) %v183_v29, 16 }
  0x77   : > { %668 = vxpose.xlu1.b32.end [2/2] (short) (narrow) %v186_v30, 16  ;;  %636 = vxpose.xlu0.b32.end [2/2] (short) (narrow) %v184_v31, 16 }
  0xbb   : > { %v235_v35 = vpop.trf.xlu1  ;;  %v203_v36 = vpop.trf.xlu0 }
  0xbf   : > { %v236_v39 = vpop.trf.xlu1  ;;  %v204_v40 = vpop.trf.xlu0 }
  0xc3   : > { %v299_v42 = vpop.trf.xlu1  ;;  %v267_v43 = vpop.trf.xlu0 }
  0xc4   : > { %v716_v46 = vcombine.high %v235_v35, %v299_v42  ;;  %v700_v47 = vcombine.high %v203_v36, %v267_v43  ;;  %v715_v9 = vcombine.low %v235_v35, %v299_v42  ;;  %v699_v10 = vcombine.low %v203_v36, %v267_v43 }
  0xc6   : > { %v2268_v48 = vrot.slane %v716_v46, %v2265_v41  ;;  %v2271_v49 = vrot.slane %v700_v47, %v2265_v41  ;;  %v2297_v13 = vrot.slane %v715_v9, %v2265_v41  ;;  %v2300_v14 = vrot.slane %v699_v10, %v2265_v41 }
  0xc7   : > { %v300_v50 = vpop.trf.xlu1  ;;  %v268_v51 = vpop.trf.xlu0 }
  0xc8   : > { %v987_v53 = vcombine.low %v236_v39, %v300_v50  ;;  %v988_v54 = vcombine.high %v236_v39, %v300_v50  ;;  %v971_v55 = vcombine.low %v204_v40, %v268_v51  ;;  %v972_v56 = vcombine.high %v204_v40, %v268_v51 }
  0xc9   : > { %v779_v57 = vcombine.low %v2271_v49, %v2268_v48  ;;  %v780_v58 = vcombine.high %v2271_v49, %v2268_v48  ;;  %v763_v23 = vcombine.low %v2300_v14, %v2297_v13 }
  0xca   : > { %v995_v59 = vrot.slane %v987_v53, %v2265_v41  ;;  %v1002_v60 = vrot.slane %v988_v54, %v2265_v41  ;;  %v979_v61 = vrot.slane %v971_v55, %v2265_v41  ;;  %v986_v62 = vrot.slane %v972_v56, %v2265_v41 }
  0xcb   : > { %v2281_v63 = vpop.trf.xlu1  ;;  %v2283_v0 = vpop.trf.xlu0  ;;  %v771_v35 = vrot.slane %v763_v23, %v2285_v1 }
  0xcc   : > { %v1035_v2 = vcombine.low %v979_v61, %v995_v59  ;;  %v1036_v3 = vcombine.high %v979_v61, %v995_v59  ;;  %v1051_v4 = vcombine.low %v986_v62, %v1002_v60  ;;  %v1052_v5 = vcombine.high %v986_v62, %v1002_v60 }
  0xce   : > { %v2288_v6 = vrot.slane %v1036_v3, %v2285_v1  ;;  %v2291_v7 = vrot.slane %v1051_v4, %v2285_v1  ;;  %v2294_v8 = vrot.slane %v1052_v5, %v2285_v1  ;;  %v2331_v44 = vrot.slane %v1035_v2, %v2285_v1 }
  0xcf   : > { %v364_v11 = vpop.trf.xlu1  ;;  %v332_v12 = vpop.trf.xlu0 }
  0xd3   : > { %v2302_v15 = vpop.trf.xlu1  ;;  %v2304_v16 = vpop.trf.xlu0 }
  0xd4   : > { %v747_v17 = vcombine.low %v2281_v63, %v2302_v15  ;;  %v731_v18 = vcombine.low %v2283_v0, %v2304_v16 }
  0xd6   : > { %v2311_v19 = vrot.slane %v747_v17, %v2265_v41  ;;  %v2314_v20 = vrot.slane %v731_v18, %v2265_v41 }
  0xd7   : > { %v428_v21 = vpop.trf.xlu1  ;;  %v396_v22 = vpop.trf.xlu0 }
  0xd8   : > { %v1019_v24 = vcombine.low %v364_v11, %v428_v21  ;;  %v1020_v25 = vcombine.high %v364_v11, %v428_v21  ;;  %v1003_v26 = vcombine.low %v332_v12, %v396_v22  ;;  %v1004_v27 = vcombine.high %v332_v12, %v396_v22 }
  0xd9   : > { %v795_v28 = vcombine.low %v2314_v20, %v2311_v19 }
  0xda   : > { %v1027_v29 = vrot.slane %v1019_v24, %v2265_v41  ;;  %v1034_v30 = vrot.slane %v1020_v25, %v2265_v41  ;;  %v1011_v31 = vrot.slane %v1003_v26, %v2265_v41  ;;  %v1018_v32 = vrot.slane %v1004_v27, %v2265_v41 }
  0xdb   : > { %v2324_v33 = vpop.trf.xlu1  ;;  %v2326_v34 = vpop.trf.xlu0  ;;  %v803_v36 = vrot.slane %v795_v28, %v2285_v1 }
  0xdc   : > { %v1067_v37 = vcombine.low %v1011_v31, %v1027_v29  ;;  %v1068_v38 = vcombine.high %v1011_v31, %v1027_v29  ;;  %v1083_v39 = vcombine.low %v1018_v32, %v1034_v30  ;;  %v1084_v40 = vcombine.high %v1018_v32, %v1034_v30 }
  0xdd   : > { %v828_v42 = vcombine.high %v771_v35, %v803_v36  ;;  %v827_v43 = vcombine.low %v771_v35, %v803_v36  ;;  %v748_v29 = vcombine.high %v2281_v63, %v2302_v15  ;;  %v732_v30 = vcombine.high %v2283_v0, %v2304_v16 }
  0xde   : > { %v2334_v47 = vrot.slane %v1067_v37, %v2285_v1  ;;  %v2337_v50 = vrot.slane %v1068_v38, %v2285_v1  ;;  %v2340_v51 = vrot.slane %v1083_v39, %v2285_v1  ;;  %v2343_v52 = vrot.slane %v1084_v40, %v2285_v1 }
  0xdf   : > { %1275 = vxpose.xlu1.b32.start [1/2] (short) (narrow) %v828_v42, 16  ;;  %1243 = vxpose.xlu0.b32.start [1/2] (short) (narrow) %v827_v43, 16  ;;  %v492_v45 = vpop.trf.xlu1  ;;  %v460_v46 = vpop.trf.xlu0  ;;  %v796_v0 = vcombine.high %v2314_v20, %v2311_v19  ;;  %v764_v40 = vcombine.high %v2300_v14, %v2297_v13  ;;  %v2400_v42 = vrot.slane %v748_v29, %v2265_v41 }
  0xe0   : > { %v1100_v53 = vcombine.high %v2331_v44, %v2334_v47  ;;  %v1099_v54 = vcombine.low %v2331_v44, %v2334_v47  ;;  %v1102_v55 = vcombine.high %v2288_v6, %v2337_v50  ;;  %v1101_v56 = vcombine.low %v2288_v6, %v2337_v50 }
  0xe1   : > { %v1104_v59 = vcombine.high %v2291_v7, %v2340_v51  ;;  %v1103_v60 = vcombine.low %v2291_v7, %v2340_v51  ;;  %v1106_v61 = vcombine.high %v2294_v8, %v2343_v52  ;;  %v1105_v62 = vcombine.low %v2294_v8, %v2343_v52 }
  0xe2   : > { %v2403_v43 = vrot.slane %v732_v30, %v2265_v41  ;;  %v810_v19 = vrot.slane %v796_v0, %v2285_v1  ;;  %v778_v13 = vrot.slane %v764_v40, %v2285_v1 }
  0xe3   : > { %v2361_v2 = vpop.trf.xlu1  ;;  %v2363_v3 = vpop.trf.xlu0 }
  0xe4   : > { %v851_v31 = vcombine.low %v2324_v33, %v2361_v2  ;;  %v835_v32 = vcombine.low %v2326_v34, %v2363_v3 }
  0xe6   : > { %v859_v15 = vrot.slane %v851_v31, %v2265_v41  ;;  %v843_v16 = vrot.slane %v835_v32, %v2265_v41 }
  0xe7   : > { %v556_v4 = vpop.trf.xlu1  ;;  %v524_v5 = vpop.trf.xlu0 }
  0xe8   : > { %v1123_v9 = vcombine.low %v492_v45, %v556_v4  ;;  %v1124_v10 = vcombine.high %v492_v45, %v556_v4  ;;  %v1107_v11 = vcombine.low %v460_v46, %v524_v5  ;;  %v1108_v12 = vcombine.high %v460_v46, %v524_v5 }
  0xe9   : > { %v899_v20 = vcombine.low %v843_v16, %v859_v15  ;;  %v900_v29 = vcombine.high %v843_v16, %v859_v15 }
  0xea   : > { %v1131_v17 = vrot.slane %v1123_v9, %v2265_v41  ;;  %v1138_v18 = vrot.slane %v1124_v10, %v2265_v41  ;;  %v1115_v21 = vrot.slane %v1107_v11, %v2265_v41  ;;  %v1122_v22 = vrot.slane %v1108_v12, %v2265_v41 }
  0xeb   : > { %v2369_v23 = vpop.trf.xlu1  ;;  %v2371_v24 = vpop.trf.xlu0  ;;  %v811_v12 = vcombine.low %v2403_v43, %v2400_v42  ;;  %v907_v31 = vrot.slane %v899_v20, %v2285_v1  ;;  %v829_v20 = vcombine.low %v778_v13, %v810_v19 }
  0xec   : > { %v1171_v25 = vcombine.low %v1115_v21, %v1131_v17  ;;  %v1172_v26 = vcombine.high %v1115_v21, %v1131_v17  ;;  %v1187_v27 = vcombine.low %v1122_v22, %v1138_v18  ;;  %v1188_v28 = vcombine.high %v1122_v22, %v1138_v18 }
  0xed   : > { %v852_v17 = vcombine.high %v2324_v33, %v2361_v2  ;;  %v836_v18 = vcombine.high %v2326_v34, %v2363_v3  ;;  %v830_v22 = vcombine.high %v778_v13, %v810_v19 }
  0xee   : > { %v2382_v37 = vrot.slane %v1171_v25, %v2285_v1  ;;  %v2385_v38 = vrot.slane %v1172_v26, %v2285_v1  ;;  %v2388_v39 = vrot.slane %v1187_v27, %v2285_v1  ;;  %v2391_v63 = vrot.slane %v1188_v28, %v2285_v1 }
  0xef   : > { %v620_v35 = vpop.trf.xlu1  ;;  %v588_v36 = vpop.trf.xlu0 }
  0xf3   : > { %v683_v45 = vpop.trf.xlu1  ;;  %v651_v46 = vpop.trf.xlu0 }
  0xf4   : > { %v883_v4 = vcombine.low %v2369_v23, %v683_v45  ;;  %v867_v5 = vcombine.low %v2371_v24, %v651_v46  ;;  %v884_v30 = vcombine.high %v2369_v23, %v683_v45  ;;  %v868_v3 = vcombine.high %v2371_v24, %v651_v46 }
  0xf6   : > { %v891_v9 = vrot.slane %v883_v4, %v2265_v41  ;;  %v875_v10 = vrot.slane %v867_v5, %v2265_v41  ;;  %v866_v4 = vrot.slane %v852_v17, %v2265_v41  ;;  %v850_v5 = vrot.slane %v836_v18, %v2265_v41 }
  0xf7   : > { %v684_v14 = vpop.trf.xlu1  ;;  %v652_v11 = vpop.trf.xlu0 }
  0xf8   : > { %v931_v21 = vcombine.low %v875_v10, %v891_v9  ;;  %v1155_v25 = vcombine.low %v620_v35, %v684_v14  ;;  %v1156_v26 = vcombine.high %v620_v35, %v684_v14  ;;  %v1139_v27 = vcombine.low %v588_v36, %v652_v11 }
  0xf9   : > { %v1140_v28 = vcombine.high %v588_v36, %v652_v11  ;;  %v932_v35 = vcombine.high %v875_v10, %v891_v9  ;;  %v914_v14 = vrot.slane %v900_v29, %v2285_v1  ;;  %v898_v9 = vrot.slane %v884_v30, %v2265_v41 }
  0xfa   : > { %v939_v32 = vrot.slane %v931_v21, %v2285_v1  ;;  %v1163_v0 = vrot.slane %v1155_v25, %v2265_v41  ;;  %v1170_v33 = vrot.slane %v1156_v26, %v2265_v41  ;;  %v1147_v2 = vrot.slane %v1139_v27, %v2265_v41 }
  0xfb   : > { %v1154_v34 = vrot.slane %v1140_v28, %v2265_v41  ;;  %v882_v10 = vrot.slane %v868_v3, %v2265_v41  ;;  %v946_v21 = vrot.slane %v932_v35, %v2285_v1  ;;  %v916_v35 = vcombine.high %v850_v5, %v866_v4 }
  0xfc   : > { %v964_v40 = vcombine.high %v907_v31, %v939_v32  ;;  %v963_v36 = vcombine.low %v907_v31, %v939_v32  ;;  %v1203_v15 = vcombine.low %v1147_v2, %v1163_v0  ;;  %v1204_v16 = vcombine.high %v1147_v2, %v1163_v0 }
  0xfd   : > { %v1219_v23 = vcombine.low %v1154_v34, %v1170_v33  ;;  %v1220_v45 = vcombine.high %v1154_v34, %v1170_v33  ;;  %v947_v29 = vcombine.low %v882_v10, %v898_v9  ;;  %v966_v30 = vcombine.high %v914_v14, %v946_v21 }
  0xfe   : > { %1276 = vxpose.xlu1.b32.end [2/2] (short) (narrow) %v964_v40, 16  ;;  %1244 = vxpose.xlu0.b32.end [2/2] (short) (narrow) %v963_v36, 16  ;;  %v1211_v11 = vrot.slane %v1203_v15, %v2285_v1  ;;  %v1218_v24 = vrot.slane %v1204_v16, %v2285_v1  ;;  %v965_v31 = vcombine.low %v914_v14, %v946_v21 }
  0xff   : > { %v1227_v46 = vrot.slane %v1219_v23, %v2285_v1  ;;  %v1234_v17 = vrot.slane %v1220_v45, %v2285_v1  ;;  %v819_v32 = vrot.slane %v811_v12, %v2285_v1  ;;  %v948_v12 = vcombine.high %v882_v10, %v898_v9 }
 0x100   : > { %v1236_v18 = vcombine.high %v2382_v37, %v1211_v11  ;;  %v1235_v19 = vcombine.low %v2382_v37, %v1211_v11  ;;  %v1238_v13 = vcombine.high %v2385_v38, %v1218_v24  ;;  %v1237_v25 = vcombine.low %v2385_v38, %v1218_v24 }
 0x101   : > { %v1240_v26 = vcombine.high %v2388_v39, %v1227_v46  ;;  %v1239_v27 = vcombine.low %v2388_v39, %v1227_v46  ;;  %v1242_v41 = vcombine.high %v2391_v63, %v1234_v17  ;;  %v1241_v28 = vcombine.low %v2391_v63, %v1234_v17 }
 0x102   : > { %1339 = vxpose.xlu1.b32.start [1/2] (short) (narrow) %v830_v22, 16  ;;  %1307 = vxpose.xlu0.b32.start [1/2] (short) (narrow) %v829_v20, 16  ;;  %v915_v37 = vcombine.low %v850_v5, %v866_v4  ;;  %v787_v38 = vrot.slane %v779_v57, %v2285_v1  ;;  %v955_v39 = vrot.slane %v947_v29, %v2285_v1 }
 0x103   : > { %v812_v63 = vcombine.high %v2403_v43, %v2400_v42  ;;  %v794_v57 = vrot.slane %v780_v58, %v2285_v1  ;;  %v962_v42 = vrot.slane %v948_v12, %v2285_v1  ;;  %v930_v43 = vrot.slane %v916_v35, %v2285_v1 }
 0x104   : > { %v832_v22 = vcombine.high %v787_v38, %v819_v32  ;;  %v831_v0 = vcombine.low %v787_v38, %v819_v32  ;;  %v923_v33 = vrot.slane %v915_v37, %v2285_v1 }
 0x105   : > { %v826_v3 = vrot.slane %v812_v63, %v2285_v1  ;;  %v970_v15 = vcombine.high %v930_v43, %v962_v42  ;;  %v969_v16 = vcombine.low %v930_v43, %v962_v42 }
 0x106   : > { %1340 = vxpose.xlu1.b32.end [2/2] (short) (narrow) %v966_v30, 16  ;;  %1308 = vxpose.xlu0.b32.end [2/2] (short) (narrow) %v965_v31, 16  ;;  %v968_v2 = vcombine.high %v923_v33, %v955_v39  ;;  %v967_v34 = vcombine.low %v923_v33, %v955_v39 }
 0x107   : > { %v834_v40 = vcombine.high %v794_v57, %v826_v3  ;;  %v833_v36 = vcombine.low %v794_v57, %v826_v3 }
 0x10a   : > { %1403 = vxpose.xlu1.b32.start [1/2] (short) (narrow) %v832_v22, 16  ;;  %1371 = vxpose.xlu0.b32.start [1/2] (short) (narrow) %v831_v0, 16 }
 0x10e   : > { %1404 = vxpose.xlu1.b32.end [2/2] (short) (narrow) %v968_v2, 16  ;;  %1372 = vxpose.xlu0.b32.end [2/2] (short) (narrow) %v967_v34, 16 }
 0x112   : > { %1467 = vxpose.xlu1.b32.start [1/2] (short) (narrow) %v834_v40, 16  ;;  %1435 = vxpose.xlu0.b32.start [1/2] (short) (narrow) %v833_v36, 16 }
 0x116   : > { %1468 = vxpose.xlu1.b32.end [2/2] (short) (narrow) %v970_v15, 16  ;;  %1436 = vxpose.xlu0.b32.end [2/2] (short) (narrow) %v969_v16, 16 }
 0x11a   : > { %1531 = vxpose.xlu1.b32.start [1/2] (short) (narrow) %v1100_v53, 16  ;;  %1499 = vxpose.xlu0.b32.start [1/2] (short) (narrow) %v1099_v54, 16 }
 0x11e   : > { %1532 = vxpose.xlu1.b32.end [2/2] (short) (narrow) %v1236_v18, 16  ;;  %1500 = vxpose.xlu0.b32.end [2/2] (short) (narrow) %v1235_v19, 16 }
 0x122   : > { %1595 = vxpose.xlu1.b32.start [1/2] (short) (narrow) %v1102_v55, 16  ;;  %1563 = vxpose.xlu0.b32.start [1/2] (short) (narrow) %v1101_v56, 16 }
 0x126   : > { %1596 = vxpose.xlu1.b32.end [2/2] (short) (narrow) %v1238_v13, 16  ;;  %1564 = vxpose.xlu0.b32.end [2/2] (short) (narrow) %v1237_v25, 16 }
 0x12a   : > { %1659 = vxpose.xlu1.b32.start [1/2] (short) (narrow) %v1104_v59, 16  ;;  %1627 = vxpose.xlu0.b32.start [1/2] (short) (narrow) %v1103_v60, 16 }
 0x12e   : > { %1660 = vxpose.xlu1.b32.end [2/2] (short) (narrow) %v1240_v26, 16  ;;  %1628 = vxpose.xlu0.b32.end [2/2] (short) (narrow) %v1239_v27, 16 }
 0x132   : > { %1723 = vxpose.xlu1.b32.start [1/2] (short) (narrow) %v1106_v61, 16  ;;  %1691 = vxpose.xlu0.b32.start [1/2] (short) (narrow) %v1105_v62, 16 }
 0x136   : > { %1724 = vxpose.xlu1.b32.end [2/2] (short) (narrow) %v1242_v41, 16  ;;  %1692 = vxpose.xlu0.b32.end [2/2] (short) (narrow) %v1241_v28, 16 }
 0x17a   : > { %v1291_v48 = vpop.trf.xlu1  ;;  %v1259_v49 = vpop.trf.xlu0 }
 0x17b   : > { %1758 = vst.msk [vmem:[%s2485_s18 + $0x10] sm:$0xff] %vm1755_vm0, %v1291_v48  ;;  %1756 = vst.msk [vmem:[%s2485_s18] sm:$0xff] %vm1755_vm0, %v1259_v49 }
 0x17e   : > { %v1292_v58 = vpop.trf.xlu1  ;;  %v1260_v1 = vpop.trf.xlu0 }
 0x17f   : > { %1759 = vst.msk [vmem:[%s2485_s18 + $0x18] sm:$0xff] %vm1755_vm0, %v1292_v58  ;;  %1757 = vst.msk [vmem:[%s2485_s18 + $0x8] sm:$0xff] %vm1755_vm0, %v1260_v1 }
 0x182   : > { %v1355_v6 = vpop.trf.xlu1  ;;  %v1323_v7 = vpop.trf.xlu0 }
 0x183   : > { %1762 = vst.msk [vmem:[%s2485_s18 + $0x30] sm:$0xff] %vm1755_vm0, %v1355_v6  ;;  %1760 = vst.msk [vmem:[%s2485_s18 + $0x20] sm:$0xff] %vm1755_vm0, %v1323_v7 }
 0x186   : > { %v1356_v8 = vpop.trf.xlu1  ;;  %v1324_v44 = vpop.trf.xlu0 }
 0x187   : > { %1763 = vst.msk [vmem:[%s2485_s18 + $0x38] sm:$0xff] %vm1755_vm0, %v1356_v8  ;;  %1761 = vst.msk [vmem:[%s2485_s18 + $0x28] sm:$0xff] %vm1755_vm0, %v1324_v44 }
 0x18a   : > { %v1419_v47 = vpop.trf.xlu1  ;;  %v1387_v50 = vpop.trf.xlu0 }
 0x18b   : > { %1766 = vst.msk [vmem:[%s2485_s18 + $0x50] sm:$0xff] %vm1755_vm0, %v1419_v47  ;;  %1764 = vst.msk [vmem:[%s2485_s18 + $0x40] sm:$0xff] %vm1755_vm0, %v1387_v50 }
 0x18e   : > { %v1420_v51 = vpop.trf.xlu1  ;;  %v1388_v52 = vpop.trf.xlu0 }
 0x18f   : > { %1767 = vst.msk [vmem:[%s2485_s18 + $0x58] sm:$0xff] %vm1755_vm0, %v1420_v51  ;;  %1765 = vst.msk [vmem:[%s2485_s18 + $0x48] sm:$0xff] %vm1755_vm0, %v1388_v52 }
 0x192   : > { %v1483_v53 = vpop.trf.xlu1  ;;  %v1451_v54 = vpop.trf.xlu0 }
 0x193   : > { %1770 = vst.msk [vmem:[%s2485_s18 + $0x70] sm:$0xff] %vm1755_vm0, %v1483_v53  ;;  %1768 = vst.msk [vmem:[%s2485_s18 + $0x60] sm:$0xff] %vm1755_vm0, %v1451_v54 }
 0x196   : > { %v1484_v55 = vpop.trf.xlu1  ;;  %v1452_v56 = vpop.trf.xlu0 }
 0x197   : > { %1771 = vst.msk [vmem:[%s2485_s18 + $0x78] sm:$0xff] %vm1755_vm0, %v1484_v55  ;;  %1769 = vst.msk [vmem:[%s2485_s18 + $0x68] sm:$0xff] %vm1755_vm0, %v1452_v56 }
 0x19a   : > { %v1547_v59 = vpop.trf.xlu1  ;;  %v1515_v60 = vpop.trf.xlu0 }
 0x19b   : > { %1774 = vst.msk [vmem:[%s2485_s18 + $0x90] sm:$0xff] %vm1755_vm0, %v1547_v59  ;;  %1772 = vst.msk [vmem:[%s2485_s18 + $0x80] sm:$0xff] %vm1755_vm0, %v1515_v60 }
 0x19e   : > { %v1548_v61 = vpop.trf.xlu1  ;;  %v1516_v62 = vpop.trf.xlu0 }
 0x19f   : > { %1775 = vst.msk [vmem:[%s2485_s18 + $0x98] sm:$0xff] %vm1755_vm0, %v1548_v61  ;;  %1773 = vst.msk [vmem:[%s2485_s18 + $0x88] sm:$0xff] %vm1755_vm0, %v1516_v62 }
 0x1a2   : > { %v1611_v23 = vpop.trf.xlu1  ;;  %v1579_v45 = vpop.trf.xlu0 }
 0x1a3   : > { %1778 = vst.msk [vmem:[%s2485_s18 + $0xb0] sm:$0xff] %vm1755_vm0, %v1611_v23  ;;  %1776 = vst.msk [vmem:[%s2485_s18 + $0xa0] sm:$0xff] %vm1755_vm0, %v1579_v45 }
 0x1a6   : > { %v1612_v4 = vpop.trf.xlu1  ;;  %v1580_v5 = vpop.trf.xlu0 }
 0x1a7   : > { %1779 = vst.msk [vmem:[%s2485_s18 + $0xb8] sm:$0xff] %vm1755_vm0, %v1612_v4  ;;  %1777 = vst.msk [vmem:[%s2485_s18 + $0xa8] sm:$0xff] %vm1755_vm0, %v1580_v5 }
 0x1aa   : > { %v1675_v20 = vpop.trf.xlu1  ;;  %v1643_v14 = vpop.trf.xlu0 }
 0x1ab   : > { %1782 = vst.msk [vmem:[%s2485_s18 + $0xd0] sm:$0xff] %vm1755_vm0, %v1675_v20  ;;  %1780 = vst.msk [vmem:[%s2485_s18 + $0xc0] sm:$0xff] %vm1755_vm0, %v1643_v14 }
 0x1ae   : > { %v1676_v11 = vpop.trf.xlu1  ;;  %v1644_v24 = vpop.trf.xlu0 }
 0x1af   : > { %1783 = vst.msk [vmem:[%s2485_s18 + $0xd8] sm:$0xff] %vm1755_vm0, %v1676_v11  ;;  %1781 = vst.msk [vmem:[%s2485_s18 + $0xc8] sm:$0xff] %vm1755_vm0, %v1644_v24 }
 0x1b2   : > { %v1739_v46 = vpop.trf.xlu1  ;;  %v1707_v9 = vpop.trf.xlu0 }
 0x1b3   : > { %1786 = vst.msk [vmem:[%s2485_s18 + $0xf0] sm:$0xff] %vm1755_vm0, %v1739_v46  ;;  %1784 = vst.msk [vmem:[%s2485_s18 + $0xe0] sm:$0xff] %vm1755_vm0, %v1707_v9 }
 0x1b6   : > { %v1740_v10 = vpop.trf.xlu1  ;;  %v1708_v21 = vpop.trf.xlu0 }
 0x1b7   : > { %1787 = vst.msk [vmem:[%s2485_s18 + $0xf8] sm:$0xff] %vm1755_vm0, %v1740_v10  ;;  %1785 = vst.msk [vmem:[%s2485_s18 + $0xe8] sm:$0xff] %vm1755_vm0, %v1708_v21 }
 0x1b8   : > { %2020 = shalt.err (!%p2017_p5)
}
 0x1b9   : > { %s2021_s17 = scalar_lea.hbm %s2552_s5, 4096  ;;  %s2025_s24 = scalar_lea.hbm %s2608_s1, 8192 }
 0x1ba   : > { %p2022_p4 = scmp.ne.s32.totalorder %s2552_s5, %s2021_s17  ;;  %p2026_p12 = scmp.lt.u32.totalorder %s2552_s5, %s2608_s1 }
 0x1bb   : > { %p2027_p1 = scmp.lt.u32.totalorder %s2025_s24, %s2021_s17  ;;  %p2029_p8 = scmp.lt.u32.totalorder %s2021_s17, %s2552_s5 }
 0x1bc   : > { %p2023_p7 = pnand %p2022_p4, %p2616_p9 }
 0x1bd   : > { %p2028_p3 = por %p2027_p1, %p2026_p12 }
 0x1be   : > { %p2024_p10 = pneg %p2023_p7 }
 0x1bf   : > { %p2030_p11 = por %p2029_p8, %p2028_p3 }
 0x1c1   : > { %p2031_p0 = pnand %p2030_p11, %p2024_p10 }
 0x1c3   : > { %2034 = shalt.err (!%p2031_p0)
}
 0x1c4   : > { %s2097_s3 = smov 128   ;;  %s2098_s4 = smov 8  }
 0x1c5   : > { %1910 = dma.vmem_to_hbm [thread:$0]  (%p2616_p9), %s2554_s29, 4096, %s2552_s5, %s1789_s9, %s2097_s3, %s2097_s3, %s2098_s4  }
 0x1c6 PF: > { %s1819_s18 = sand.u32 1, %s2069_s6   ;;  %p2617_p6 = scmp.ne.s32.totalorder %s2613_s21, 0 }
 0x1c7   : > { %p2618_p13 = scmp.ge.s32.totalorder %s2089_s11, 2  ;;  %s1820_s27 = scalar_lea.sflag [#allocation4], %s1819_s18 }
 0x1c9   : > { %p1917_p2 = pnand %p2618_p13, %p2617_p6 }
 0x1cb   : > { %2064 = dma.done.wait (!%p1917_p2), %s1820_s27, 4096  }
 0x1cc   : > { %2066 = vsyncadd (!%p1917_p2), %s1820_s27, 4294963200  ;;  %s17_s11 = sadd.s32 1, %s2089_s11   ;;  %s2619_s6 = smov %s2073_s7 }
 0x1cd   : > { %p14_p5 = scmp.ge.s32.totalorder %s17_s11, 4   ;;  %s2620_s7 = smov %s2077_s8 }
 0x1ce   : > { %s2621_s8 = smov %s2165_s20  ;;  %s2622_s9 = smov %s2085_s10 }
 0x1cf   : > { %s2623_s10 = smov %s2625_s14  ;;  %16 = sbr.rel (!%p14_p5) target bundleno = 6 (0x6), region = 69 }
 0x1d6   :  { %1825 = vsyncpa [#allocation3], 1 }
 0x1d7   :  { %1827 = vsyncpa [#allocation3 + $0x1], 1 }
 0x1d8   :  { %1828 = vsyncpa [#allocation4], 1 }
 0x1d9   :  { %1830 = vsyncpa [#allocation4 + $0x1], 1 }

</bundles_post_ra>
